<compile_context>
chip_gen: v7x
topology: tpu7x:2x2x1
jax: 0.10.0
libtpu: 0.0.40
codegen_flags: <defaults>
</compile_context>

<pallas_src>
import jax
import jax.numpy as jnp
from jax.experimental import pallas as pl
from jax.experimental.pallas import tpu as pltpu

# ---- "pm" hyperparameters (synthetic, small) --------------------------------
STATE_DIM = (10, 32)          # only STATE_DIM[1] is used by PNet
NUM_NEURONS_PER_FCN = 64
NUM_FCN_LAYERS = 3
ACTION_DIM = 8

N_EXTRA_HIDDEN = NUM_FCN_LAYERS - 1   # hidden->hidden Linear+ReLU layers

# Lane-dense padded widths (multiples of 128 lanes) for the in-kernel compute.
H_PAD = 128                   # padded hidden width
A_PAD = 128                   # padded action width (compute only; store is 8)


def _round_up(n, m):
    return ((n + m - 1) // m) * m


def pnet_kernel(x_ref, w1_ref, b1_ref, wh_ref, bh_ref, wo_ref, bo_ref, o_ref):
    """PNet forward for one (TB, D_in) batch tile; weights are VMEM-resident.

    x_ref : (TB, D_in)
    w1_ref: (D_in, H_PAD)          b1_ref: (1, H_PAD)
    wh_ref: (L-1, H_PAD, H_PAD)    bh_ref: (L-1, 1, H_PAD)
    wo_ref: (H_PAD, A_PAD)         bo_ref: (1, A_PAD)  (cols >= ACTION_DIM hold -1e30)
    o_ref : (TB, ACTION_DIM)  -- softmax probabilities (only real columns stored)
    """
    x = x_ref[...]

    # first Linear + ReLU  (padded hidden columns compute to relu(0)=0)
    h = jnp.dot(x, w1_ref[...], preferred_element_type=jnp.float32) + b1_ref[...]
    h = jnp.maximum(h, 0.0)

    # remaining hidden Linear + ReLU layers (static unrolled loop)
    for i in range(N_EXTRA_HIDDEN):
        h = jnp.dot(h, wh_ref[i], preferred_element_type=jnp.float32) + bh_ref[i]
        h = jnp.maximum(h, 0.0)

    # output Linear; padded action columns get bias -1e30 -> exp() underflows to 0
    logits = jnp.dot(h, wo_ref[...], preferred_element_type=jnp.float32) + bo_ref[...]

    # numerically-stable softmax along last axis (== torch dim=1 for 2-D input)
    m = jnp.max(logits, axis=-1, keepdims=True)
    e = jnp.exp(logits - m)
    denom = jnp.sum(e, axis=-1, keepdims=True)
    inv = pl.reciprocal(denom)               # exact; compute slack makes it free

    # store only the real action columns (16x less HBM writeback than A_PAD)
    o_ref[...] = (e[:, :ACTION_DIM] * inv).astype(o_ref.dtype)


def pnet_forward(x, padded_params, tb=2048):
    """Runs the Pallas PNet kernel over a batch grid and returns (B, ACTION_DIM)."""
    w1p, b1p, whp, bhp, wop, bop = padded_params
    B, D = x.shape

    # Batch tile: multiple of 8 sublanes, capped at `tb`, and capped at
    # ceil(B/2) so v7x's 2 TensorCores both get work for medium batches.
    half = _round_up(pl.cdiv(B, 2), 8)
    TB = max(8, min(tb, half))
    B_pad = _round_up(B, TB)
    if B_pad != B:
        x = jnp.pad(x, ((0, B_pad - B), (0, 0)))   # zero rows, discarded on slice

    grid = (B_pad // TB,)

    # Advisory cost model (per review): MLP flops + exp count + real HBM bytes.
    weight_bytes = 4 * sum(int(p.size) for p in padded_params)
    flops = 2 * B_pad * (D * H_PAD + N_EXTRA_HIDDEN * H_PAD * H_PAD + H_PAD * A_PAD)
    transcendentals = B_pad * A_PAD
    bytes_accessed = 4 * B_pad * (D + ACTION_DIM) + weight_bytes

    out = pl.pallas_call(
        pnet_kernel,
        out_shape=jax.ShapeDtypeStruct((B_pad, ACTION_DIM), jnp.float32),
        grid=grid,
        in_specs=[
            pl.BlockSpec((TB, D), lambda i: (i, 0)),          # x: tiled over batch
            pl.BlockSpec(w1p.shape, lambda i: (0, 0)),        # weights: VMEM-resident
            pl.BlockSpec(b1p.shape, lambda i: (0, 0)),
            pl.BlockSpec(whp.shape, lambda i: (0, 0, 0)),
            pl.BlockSpec(bhp.shape, lambda i: (0, 0, 0)),
            pl.BlockSpec(wop.shape, lambda i: (0, 0)),
            pl.BlockSpec(bop.shape, lambda i: (0, 0)),
        ],
        out_specs=pl.BlockSpec((TB, ACTION_DIM), lambda i: (i, 0)),
        compiler_params=pltpu.CompilerParams(
            dimension_semantics=("parallel",),                # 2-TC sharding on v7x
            vmem_limit_bytes=48 * 1024 * 1024,                # headroom for big TB
        ),
        cost_estimate=pl.CostEstimate(
            flops=flops,
            transcendentals=transcendentals,
            bytes_accessed=bytes_accessed,
        ),
    )(x, w1p, b1p, whp, bhp, wop, bop)

    return out[:B]


def init_params(key):
    """Deterministic logical parameters (shapes match PNet.__init__)."""
    ks = jax.random.split(key, 8)
    D, H, A = STATE_DIM[1], NUM_NEURONS_PER_FCN, ACTION_DIM
    scale = 0.1
    w1 = scale * jax.random.normal(ks[0], (D, H), jnp.float32)
    b1 = scale * jax.random.normal(ks[1], (1, H), jnp.float32)
    wh = scale * jax.random.normal(ks[2], (N_EXTRA_HIDDEN, H, H), jnp.float32)
    bh = scale * jax.random.normal(ks[3], (N_EXTRA_HIDDEN, 1, H), jnp.float32)
    wo = scale * jax.random.normal(ks[4], (H, A), jnp.float32)
    bo = scale * jax.random.normal(ks[5], (1, A), jnp.float32)
    return w1, b1, wh, bh, wo, bo


def pad_params(params):
    """Zero-pad logical params to lane-dense (128-wide) kernel params.

    The padded output-bias columns carry -1e30 so padded logits never leak
    into the softmax denominator (padded wo columns are zero, so those logits
    are exactly -1e30 and exp() underflows to 0).
    """
    w1, b1, wh, bh, wo, bo = params
    D, H = w1.shape
    A = wo.shape[1]
    w1p = jnp.zeros((D, H_PAD), jnp.float32).at[:, :H].set(w1)
    b1p = jnp.zeros((1, H_PAD), jnp.float32).at[:, :H].set(b1)
    whp = jnp.zeros((N_EXTRA_HIDDEN, H_PAD, H_PAD), jnp.float32).at[:, :H, :H].set(wh)
    bhp = jnp.zeros((N_EXTRA_HIDDEN, 1, H_PAD), jnp.float32).at[:, :, :H].set(bh)
    wop = jnp.zeros((H_PAD, A_PAD), jnp.float32).at[:H, :A].set(wo)
    bop = jnp.full((1, A_PAD), -1e30, jnp.float32).at[:, :A].set(bo)
    return w1p, b1p, whp, bhp, wop, bop


def pnet_reference(x, params):
    """Pure-JAX reference of the same forward pass (unpadded)."""
    w1, b1, wh, bh, wo, bo = params
    h = jnp.maximum(x @ w1 + b1, 0.0)
    for i in range(N_EXTRA_HIDDEN):
        h = jnp.maximum(h @ wh[i] + bh[i], 0.0)
    logits = h @ wo + bo
    return jax.nn.softmax(logits, axis=-1)


if __name__ == "__main__":
    key = jax.random.PRNGKey(0)
    k_x, k_x2, k_p = jax.random.split(key, 3)

    params = init_params(k_p)
    padded_params = pad_params(params)

    # --- small demo batch (B=2) ------------------------------------------------
    B = 2
    x = jax.random.normal(k_x, (B, STATE_DIM[1]), jnp.float32)
    out = jax.block_until_ready(pnet_forward(x, padded_params))
    ref = pnet_reference(x, params)
    assert out.shape == (B, ACTION_DIM)
    assert jnp.allclose(jnp.sum(out, axis=-1), 1.0, atol=1e-3)
    assert jnp.allclose(out, ref, atol=2e-3, rtol=2e-3)

    # --- larger batch exercising the multi-step grid + wrapper padding ---------
    B2 = 300                      # not a multiple of TB -> wrapper zero-pads rows
    x2 = jax.random.normal(k_x2, (B2, STATE_DIM[1]), jnp.float32)
    out2 = jax.block_until_ready(pnet_forward(x2, padded_params, tb=128))
    ref2 = pnet_reference(x2, params)
    assert out2.shape == (B2, ACTION_DIM)
    assert jnp.allclose(jnp.sum(out2, axis=-1), 1.0, atol=1e-3)
    assert jnp.allclose(out2, ref2, atol=2e-3, rtol=2e-3)

    print("KERNEL_OK")
</pallas_src>

<mosaic_0001>
module attributes {stable_mosaic.version = 11 : i64} {
  func.func @pnet_kernel(%arg0: i32, %arg1: memref<8x32xf32, #tpu.memory_space<vmem>>, %arg2: memref<32x128xf32, #tpu.memory_space<vmem>>, %arg3: memref<1x128xf32, #tpu.memory_space<vmem>>, %arg4: memref<2x128x128xf32, #tpu.memory_space<vmem>>, %arg5: memref<2x1x128xf32, #tpu.memory_space<vmem>>, %arg6: memref<128x128xf32, #tpu.memory_space<vmem>>, %arg7: memref<1x128xf32, #tpu.memory_space<vmem>>, %arg8: memref<8x8xf32, #tpu.memory_space<vmem>>) attributes {dimension_semantics = [#tpu.dimension_semantics<parallel>], iteration_bounds = array<i64: 1>, scalar_prefetch = 0 : i64, scratch_operands = 0 : i64, tpu.core_type = #tpu.core_type<tc>, window_params = [{transform_indices = @transform_0, window_bounds = array<i64: 8, 32>}, {pipeline_mode = #tpu.pipeline_mode<synchronous>, transform_indices = @transform_1, window_bounds = array<i64: 32, 128>}, {pipeline_mode = #tpu.pipeline_mode<synchronous>, transform_indices = @transform_2, window_bounds = array<i64: 1, 128>}, {pipeline_mode = #tpu.pipeline_mode<synchronous>, transform_indices = @transform_3, window_bounds = array<i64: 2, 128, 128>}, {pipeline_mode = #tpu.pipeline_mode<synchronous>, transform_indices = @transform_4, window_bounds = array<i64: 2, 1, 128>}, {pipeline_mode = #tpu.pipeline_mode<synchronous>, transform_indices = @transform_5, window_bounds = array<i64: 128, 128>}, {pipeline_mode = #tpu.pipeline_mode<synchronous>, transform_indices = @transform_6, window_bounds = array<i64: 1, 128>}, {transform_indices = @transform_7, window_bounds = array<i64: 8, 8>}]} {
    %c0 = arith.constant 0 : index
    %c0_0 = arith.constant 0 : index
    %0 = vector.load %arg1[%c0, %c0_0] : memref<8x32xf32, #tpu.memory_space<vmem>>, vector<8x32xf32>
    %c0_1 = arith.constant 0 : index
    %c0_2 = arith.constant 0 : index
    %1 = vector.load %arg2[%c0_1, %c0_2] : memref<32x128xf32, #tpu.memory_space<vmem>>, vector<32x128xf32>
    %cst = arith.constant dense<0.000000e+00> : vector<8x128xf32>
    %2 = tpu.matmul %0, %1, %cst {dimension_numbers = #tpu.dot_dimension_numbers<[1], [0], [0], [1], [0, 0, 1, 1], [], []>} : vector<8x32xf32>, vector<32x128xf32>, vector<8x128xf32> -> vector<8x128xf32>
    %c0_3 = arith.constant 0 : index
    %c0_4 = arith.constant 0 : index
    %3 = vector.load %arg3[%c0_3, %c0_4] : memref<1x128xf32, #tpu.memory_space<vmem>>, vector<1x128xf32>
    %4 = vector.broadcast %3 : vector<1x128xf32> to vector<8x128xf32>
    %5 = arith.addf %2, %4 : vector<8x128xf32>
    %cst_5 = arith.constant 0.000000e+00 : f32
    %6 = vector.broadcast %cst_5 : f32 to vector<8x128xf32>
    %7 = arith.maximumf %5, %6 : vector<8x128xf32>
    %c0_6 = arith.constant 0 : index
    %c0_7 = arith.constant 0 : index
    %c0_8 = arith.constant 0 : index
    %8 = vector.load %arg4[%c0_6, %c0_7, %c0_8] : memref<2x128x128xf32, #tpu.memory_space<vmem>>, vector<1x128x128xf32>
    %9 = vector.shape_cast %8 : vector<1x128x128xf32> to vector<128x128xf32>
    %cst_9 = arith.constant dense<0.000000e+00> : vector<8x128xf32>
    %10 = tpu.matmul %7, %9, %cst_9 {dimension_numbers = #tpu.dot_dimension_numbers<[1], [0], [0], [1], [0, 0, 1, 1], [], []>} : vector<8x128xf32>, vector<128x128xf32>, vector<8x128xf32> -> vector<8x128xf32>
    %c0_10 = arith.constant 0 : index
    %c0_11 = arith.constant 0 : index
    %c0_12 = arith.constant 0 : index
    %11 = vector.load %arg5[%c0_10, %c0_11, %c0_12] : memref<2x1x128xf32, #tpu.memory_space<vmem>>, vector<1x1x128xf32>
    %12 = vector.shape_cast %11 : vector<1x1x128xf32> to vector<1x128xf32>
    %13 = vector.broadcast %12 : vector<1x128xf32> to vector<8x128xf32>
    %14 = arith.addf %10, %13 : vector<8x128xf32>
    %cst_13 = arith.constant 0.000000e+00 : f32
    %15 = vector.broadcast %cst_13 : f32 to vector<8x128xf32>
    %16 = arith.maximumf %14, %15 : vector<8x128xf32>
    %c1 = arith.constant 1 : index
    %c0_14 = arith.constant 0 : index
    %c0_15 = arith.constant 0 : index
    %17 = vector.load %arg4[%c1, %c0_14, %c0_15] : memref<2x128x128xf32, #tpu.memory_space<vmem>>, vector<1x128x128xf32>
    %18 = vector.shape_cast %17 : vector<1x128x128xf32> to vector<128x128xf32>
    %cst_16 = arith.constant dense<0.000000e+00> : vector<8x128xf32>
    %19 = tpu.matmul %16, %18, %cst_16 {dimension_numbers = #tpu.dot_dimension_numbers<[1], [0], [0], [1], [0, 0, 1, 1], [], []>} : vector<8x128xf32>, vector<128x128xf32>, vector<8x128xf32> -> vector<8x128xf32>
    %c1_17 = arith.constant 1 : index
    %c0_18 = arith.constant 0 : index
    %c0_19 = arith.constant 0 : index
    %20 = vector.load %arg5[%c1_17, %c0_18, %c0_19] : memref<2x1x128xf32, #tpu.memory_space<vmem>>, vector<1x1x128xf32>
    %21 = vector.shape_cast %20 : vector<1x1x128xf32> to vector<1x128xf32>
    %22 = vector.broadcast %21 : vector<1x128xf32> to vector<8x128xf32>
    %23 = arith.addf %19, %22 : vector<8x128xf32>
    %cst_20 = arith.constant 0.000000e+00 : f32
    %24 = vector.broadcast %cst_20 : f32 to vector<8x128xf32>
    %25 = arith.maximumf %23, %24 : vector<8x128xf32>
    %c0_21 = arith.constant 0 : index
    %c0_22 = arith.constant 0 : index
    %26 = vector.load %arg6[%c0_21, %c0_22] : memref<128x128xf32, #tpu.memory_space<vmem>>, vector<128x128xf32>
    %cst_23 = arith.constant dense<0.000000e+00> : vector<8x128xf32>
    %27 = tpu.matmul %25, %26, %cst_23 {dimension_numbers = #tpu.dot_dimension_numbers<[1], [0], [0], [1], [0, 0, 1, 1], [], []>} : vector<8x128xf32>, vector<128x128xf32>, vector<8x128xf32> -> vector<8x128xf32>
    %c0_24 = arith.constant 0 : index
    %c0_25 = arith.constant 0 : index
    %28 = vector.load %arg7[%c0_24, %c0_25] : memref<1x128xf32, #tpu.memory_space<vmem>>, vector<1x128xf32>
    %29 = vector.broadcast %28 : vector<1x128xf32> to vector<8x128xf32>
    %30 = arith.addf %27, %29 : vector<8x128xf32>
    %cst_26 = arith.constant dense<0xFF800000> : vector<8xf32>
    %31 = vector.multi_reduction <maximumf>, %30, %cst_26 [1] : vector<8x128xf32> to vector<8xf32>
    %32 = vector.shape_cast %31 : vector<8xf32> to vector<8x1xf32>
    %33 = vector.broadcast %32 : vector<8x1xf32> to vector<8x128xf32>
    %34 = arith.subf %30, %33 : vector<8x128xf32>
    %35 = math.exp %34 : vector<8x128xf32>
    %cst_27 = arith.constant dense<0.000000e+00> : vector<8xf32>
    %36 = vector.multi_reduction <add>, %35, %cst_27 [1] : vector<8x128xf32> to vector<8xf32>
    %37 = vector.shape_cast %36 : vector<8xf32> to vector<8x1xf32>
    %38 = tpu.reciprocal %37 : vector<8x1xf32> -> vector<8x1xf32>
    %39 = vector.extract_strided_slice %35 {offsets = [0, 0], sizes = [8, 8], strides = [1, 1]} : vector<8x128xf32> to vector<8x8xf32>
    %40 = vector.broadcast %38 : vector<8x1xf32> to vector<8x8xf32>
    %41 = arith.mulf %39, %40 : vector<8x8xf32>
    %c0_28 = arith.constant 0 : index
    %c0_29 = arith.constant 0 : index
    %42 = vector.load %arg8[%c0_28, %c0_29] : memref<8x8xf32, #tpu.memory_space<vmem>>, vector<8x8xf32>
    tpu.vector_store %arg8[%c0_28, %c0_29], %41 {strides = array<i32>} : memref<8x8xf32, #tpu.memory_space<vmem>>, vector<8x8xf32>,
    return
  }
  func.func @transform_0(%arg0: i32) -> (i32, i32) {
    %c0_i32 = arith.constant 0 : i32
    %c0_i32_0 = arith.constant 0 : i32
    return %arg0, %c0_i32 : i32, i32
  }
  func.func @transform_1(%arg0: i32) -> (i32, i32) {
    %c0_i32 = arith.constant 0 : i32
    %c0_i32_0 = arith.constant 0 : i32
    %c0_i32_1 = arith.constant 0 : i32
    return %c0_i32, %c0_i32_0 : i32, i32
  }
  func.func @transform_2(%arg0: i32) -> (i32, i32) {
    %c0_i32 = arith.constant 0 : i32
    %c0_i32_0 = arith.constant 0 : i32
    %c0_i32_1 = arith.constant 0 : i32
    return %c0_i32, %c0_i32_0 : i32, i32
  }
  func.func @transform_3(%arg0: i32) -> (i32, i32, i32) {
    %c0_i32 = arith.constant 0 : i32
    %c0_i32_0 = arith.constant 0 : i32
    %c0_i32_1 = arith.constant 0 : i32
    %c0_i32_2 = arith.constant 0 : i32
    return %c0_i32, %c0_i32_0, %c0_i32_1 : i32, i32, i32
  }
  func.func @transform_4(%arg0: i32) -> (i32, i32, i32) {
    %c0_i32 = arith.constant 0 : i32
    %c0_i32_0 = arith.constant 0 : i32
    %c0_i32_1 = arith.constant 0 : i32
    %c0_i32_2 = arith.constant 0 : i32
    return %c0_i32, %c0_i32_0, %c0_i32_1 : i32, i32, i32
  }
  func.func @transform_5(%arg0: i32) -> (i32, i32) {
    %c0_i32 = arith.constant 0 : i32
    %c0_i32_0 = arith.constant 0 : i32
    %c0_i32_1 = arith.constant 0 : i32
    return %c0_i32, %c0_i32_0 : i32, i32
  }
  func.func @transform_6(%arg0: i32) -> (i32, i32) {
    %c0_i32 = arith.constant 0 : i32
    %c0_i32_0 = arith.constant 0 : i32
    %c0_i32_1 = arith.constant 0 : i32
    return %c0_i32, %c0_i32_0 : i32, i32
  }
  func.func @transform_7(%arg0: i32) -> (i32, i32) {
    %c0_i32 = arith.constant 0 : i32
    %c0_i32_0 = arith.constant 0 : i32
    return %arg0, %c0_i32 : i32, i32
  }
}

</mosaic_0001>

<bundles_post_ra>
// kernel: tpu_custom_call.1
= control target key start
LH: loop header
LB: loop body
LE: loop exit
PB: predicated region body
PF: predicated region fallthrough
CT: control target
= control target key end

     0   :  { %12 = vsyncpa [#allocation3], 0  ;;  %s1031_s0 = inlined_call_operand.hbm [shape: f32[8,32], index: 0, kind: input, shape index: {}]   ;;  %s1032_s1 = inlined_call_operand.hbm [shape: f32[32,128], index: 1, kind: input, shape index: {}]   ;;  %s1033_s2 = inlined_call_operand.vmem [shape: f32[1,128], index: 2, kind: input, shape index: {}]   ;;  %s1034_s3 = inlined_call_operand.hbm [shape: f32[2,128,128], index: 3, kind: input, shape index: {}]   ;;  %s1035_s4 = inlined_call_operand.vmem [shape: f32[2,1,128], index: 4, kind: input, shape index: {}]   ;;  %s1036_s5 = inlined_call_operand.hbm [shape: f32[128,128], index: 5, kind: input, shape index: {}]   ;;  %s1037_s6 = inlined_call_operand.vmem [shape: f32[1,128], index: 6, kind: input, shape index: {}]   ;;  %s1038_s7 = inlined_call_operand.hbm [shape: f32[8,8], index: 7, kind: output, shape index: {}]  }
   0x1   :  { %13 = vsyncpa [#allocation6], 0 }
   0x2   :  { %14 = vsyncpa [#allocation9], 0 }
   0x3   :  { %15 = vsyncpa [#allocation4], 0  ;;  %s866_s24 = smov [#allocation5]   ;;  %s748_s28 = scalar_lea.hbm %s1032_s1, 512 }
   0x4   :  { %s31_s25 = sshll.u32 %s866_s24, 4  ;;  %p749_p0 = scmp.ne.s32.totalorder %s1032_s1, %s748_s28  ;;  %s32_s25 = int_to_ptr.vmem [resolvable:$true] %s31_s25 }
   0x5   :  { %p752_p1 = scmp.lt.u32.totalorder %s748_s28, %s1032_s1 }
   0x7   :  { %p754_p2 = pnand %p752_p1, %p749_p0 }
   0x9   :  { %757 = shalt.err (!%p754_p2)
}
   0xa   :  { %s758_s10 = scalar_lea.vmem %s32_s25, 512  ;;  %p763_p4 = scmp.lt.s32.totalorder %s32_s25, %s32_s25 }
   0xb   :  { %p759_p3 = scmp.ne.s32.totalorder %s32_s25, %s758_s10  ;;  %p764_p5 = scmp.lt.s32.totalorder %s758_s10, %s758_s10 }
   0xd   :  { %p765_p6 = por %p764_p5, %p763_p4 }
   0xf   :  { %p766_p7 = pnand %p765_p6, %p759_p3 }
  0x11   :  { %769 = shalt.err (!%p766_p7)
}
  0x12   :  { %s867_s11 = smov 128   ;;  %s868_s12 = smov 8  }
  0x13   :  { %37 = dma.hbm_to_vmem [thread:$0]  %s1032_s1, 512, %s32_s25, [#allocation6], %s867_s11, %s867_s11, %s868_s12  }
  0x14   :  { %s869_s15 = smov [#allocation2]   ;;  %s870_s17 = smov [#allocation7]  }
  0x15   :  { %s22_s16 = sshll.u32 %s869_s15, 4  ;;  %s45_s18 = sshll.u32 %s870_s17, 4  ;;  %s23_s16 = int_to_ptr.vmem [resolvable:$true] %s22_s16  ;;  %s46_s18 = int_to_ptr.vmem [resolvable:$true] %s45_s18 }
  0x16   :  { %s770_s21 = scalar_lea.hbm %s1031_s0, 128 }
  0x17   :  { %p771_p8 = scmp.ne.s32.totalorder %s1031_s0, %s770_s21  ;;  %p774_p9 = scmp.lt.u32.totalorder %s770_s21, %s1031_s0 }
  0x19   :  { %p776_p10 = pnand %p774_p9, %p771_p8 }
  0x1b   :  { %779 = shalt.err (!%p776_p10)
}
  0x1c   :  { %s780_s1 = scalar_lea.vmem %s23_s16, 128  ;;  %p785_p12 = scmp.lt.s32.totalorder %s23_s16, %s23_s16 }
  0x1d   :  { %p781_p11 = scmp.ne.s32.totalorder %s23_s16, %s780_s1  ;;  %p786_p13 = scmp.lt.s32.totalorder %s780_s1, %s780_s1 }
  0x1f   :  { %p787_p0 = por %p786_p13, %p785_p12 }
  0x21   :  { %p788_p1 = pnand %p787_p0, %p781_p11 }
  0x23   :  { %791 = shalt.err (!%p788_p1)
}
  0x24   :  { %25 = dma.hbm_to_vmem [thread:$0]  %s1031_s0, 128, %s23_s16, [#allocation3]  }
  0x25   :  { %s792_s30 = scalar_lea.hbm %s1034_s3, 4096 }
  0x26   :  { %p793_p2 = scmp.ne.s32.totalorder %s1034_s3, %s792_s30  ;;  %p796_p3 = scmp.lt.u32.totalorder %s792_s30, %s1034_s3 }
  0x28   :  { %p798_p4 = pnand %p796_p3, %p793_p2 }
  0x2a   :  { %801 = shalt.err (!%p798_p4)
}
  0x2b   :  { %s802_s14 = scalar_lea.vmem %s46_s18, 4096  ;;  %p807_p6 = scmp.lt.s32.totalorder %s46_s18, %s46_s18 }
  0x2c   :  { %p803_p5 = scmp.ne.s32.totalorder %s46_s18, %s802_s14  ;;  %p808_p7 = scmp.lt.s32.totalorder %s802_s14, %s802_s14 }
  0x2e   :  { %p809_p8 = por %p808_p7, %p807_p6 }
  0x30   :  { %p810_p9 = pnand %p809_p8, %p803_p5 }
  0x32   :  { %813 = shalt.err (!%p810_p9)
}
  0x33   :  { %51 = dma.hbm_to_vmem [thread:$0]  %s1034_s3, 4096, %s46_s18, [#allocation6], %s867_s11, %s867_s11, %s868_s12  }
  0x34   :  { %s871_s16 = smov [#allocation8]   ;;  %s814_s21 = scalar_lea.hbm %s1036_s5, 2048 }
  0x35   :  { %s59_s17 = sshll.u32 %s871_s16, 4  ;;  %p815_p10 = scmp.ne.s32.totalorder %s1036_s5, %s814_s21  ;;  %s60_s17 = int_to_ptr.vmem [resolvable:$true] %s59_s17 }
  0x36   :  { %p818_p11 = scmp.lt.u32.totalorder %s814_s21, %s1036_s5 }
  0x38   :  { %p820_p12 = pnand %p818_p11, %p815_p10 }
  0x3a   :  { %823 = shalt.err (!%p820_p12)
}
  0x3b   :  { %s824_s1 = scalar_lea.vmem %s60_s17, 2048  ;;  %p829_p0 = scmp.lt.s32.totalorder %s60_s17, %s60_s17 }
  0x3c   :  { %p825_p13 = scmp.ne.s32.totalorder %s60_s17, %s824_s1  ;;  %p830_p1 = scmp.lt.s32.totalorder %s824_s1, %s824_s1 }
  0x3e   :  { %p831_p2 = por %p830_p1, %p829_p0 }
  0x40   :  { %p832_p3 = pnand %p831_p2, %p825_p13 }
  0x42   :  { %835 = shalt.err (!%p832_p3)
}
  0x43   :  { %65 = dma.hbm_to_vmem [thread:$0]  %s1036_s5, 2048, %s60_s17, [#allocation9], %s867_s11, %s867_s11, %s868_s12  }
  0x44   :  { %858 = dma.done.wait [#allocation3], 128  }
  0x45   :  { %859 = vsyncadd [#allocation3], 4294967168 }
  0x46   :  { %860 = dma.done.wait [#allocation6], 4608  }
  0x47   :  { %861 = vsyncadd [#allocation6], 4294962688 }
  0x48   :  { %862 = dma.done.wait [#allocation9], 2048  }
  0x49   :  { %863 = vsyncadd [#allocation9], 4294965248  ;;  %v872_v0 = vmov 0.0|0.0   ;;  %vm873_vm0 = vmmov 0   ;;  %v874_v1 = vmov 0.0   ;;  %v81_v2 = vld [vmem:[#allocation5] sm:$0xff] }
  0x4a   :  { %656 = vmatprep.subr.bf16.mxu0 %v872_v0  ;;  %548 = vmatprep.mubr.msk.f32.mxu0 %vm873_vm0, %v874_v1  ;;  %v82_v3 = vld [vmem:[#allocation5 + $0x8] sm:$0xff]  ;;  %v83_v4 = vld [vmem:[#allocation5 + $0x10] sm:$0xff]  ;;  %v84_v6 = vld [vmem:[#allocation5 + $0x18] sm:$0xff]  ;;  %vm92_vm1 = vcmask 261120   ;;  %vm459_vm2 = vcmask 64512  }
  0x4b   :  { %662 = vmatprep.subr.bf16.mxu1 %v872_v0  ;;  %583 = vmatprep.mubr.msk.f32.mxu1 %vm873_vm0, %v874_v1  ;;  %v657_v5 = vpack.c.bf16 %v82_v3, %v81_v2  ;;  %v167_v7 = vld [vmem:[#allocation7] sm:$0xff]  ;;  %v168_v8 = vld [vmem:[#allocation7 + $0x8] sm:$0xff]  ;;  %v169_v9 = vld [vmem:[#allocation7 + $0x10] sm:$0xff]  ;;  %v660_v11 = vpack.c.bf16 %v84_v6, %v83_v4 }
  0x4c   :  { %v170_v10 = vld [vmem:[#allocation7 + $0x18] sm:$0xff]  ;;  %v663_v12 = vpack.c.bf16 %v168_v8, %v167_v7  ;;  %v171_v14 = vld [vmem:[#allocation7 + $0x20] sm:$0xff]  ;;  %v172_v15 = vld [vmem:[#allocation7 + $0x28] sm:$0xff] }
  0x4d   :  { %658 = vmatpush3.bf16.msra.mxu0 %v657_v5  ;;  %v666_v13 = vpack.c.bf16 %v170_v10, %v169_v9  ;;  %v80_v16 = vld [vmem:[#allocation2] sm:$0xff]  ;;  %v669_v17 = vpack.c.bf16 %v172_v15, %v171_v14  ;;  %v173_v18 = vld [vmem:[#allocation7 + $0x30] sm:$0xff]  ;;  %v175_v21 = vld [vmem:[#allocation7 + $0x40] sm:$0xff] }
  0x4e   :  { %659 = vmatprep.subr.bf16.mxu0 %v872_v0  ;;  %664 = vmatpush3.bf16.msra.mxu1 %v663_v12  ;;  %v174_v19 = vld [vmem:[#allocation7 + $0x38] sm:$0xff]  ;;  %v176_v22 = vld [vmem:[#allocation7 + $0x48] sm:$0xff]  ;;  %v177_v24 = vld [vmem:[#allocation7 + $0x50] sm:$0xff] }
  0x4f   :  { %665 = vmatprep.subr.bf16.mxu1 %v872_v0  ;;  %v672_v20 = vpack.c.bf16 %v174_v19, %v173_v18  ;;  %v675_v23 = vpack.c.bf16 %v176_v22, %v175_v21  ;;  %v178_v25 = vld [vmem:[#allocation7 + $0x58] sm:$0xff]  ;;  %v179_v27 = vld [vmem:[#allocation7 + $0x60] sm:$0xff]  ;;  %v180_v28 = vld [vmem:[#allocation7 + $0x68] sm:$0xff] }
  0x50   :  { %v678_v26 = vpack.c.bf16 %v178_v25, %v177_v24  ;;  %v681_v29 = vpack.c.bf16 %v180_v28, %v179_v27  ;;  %v181_v30 = vld [vmem:[#allocation7 + $0x70] sm:$0xff]  ;;  %v182_v31 = vld [vmem:[#allocation7 + $0x78] sm:$0xff]  ;;  %v262_v33 = vld [vmem:[#allocation7 + $0x80] sm:$0xff] }
  0x51   :  { %661 = vmatpush3.bf16.msra.mxu0 %v660_v11  ;;  %v684_v32 = vpack.c.bf16 %v182_v31, %v181_v30  ;;  %v263_v34 = vld [vmem:[#allocation7 + $0x88] sm:$0xff]  ;;  %v264_v35 = vld [vmem:[#allocation7 + $0x90] sm:$0xff]  ;;  %v265_v37 = vld [vmem:[#allocation7 + $0x98] sm:$0xff] }
  0x52   :  { %686 = vmatprep.subr.bf16.mxu0 %v872_v0  ;;  %667 = vmatpush3.bf16.msra.mxu1 %v666_v13  ;;  %v687_v36 = vpack.c.bf16 %v263_v34, %v262_v33  ;;  %v690_v38 = vpack.c.bf16 %v265_v37, %v264_v35  ;;  %v266_v39 = vld [vmem:[#allocation7 + $0xa0] sm:$0xff]  ;;  %v267_v40 = vld [vmem:[#allocation7 + $0xa8] sm:$0xff]  ;;  %v268_v42 = vld [vmem:[#allocation7 + $0xb0] sm:$0xff] }
  0x53   :  { %668 = vmatprep.subr.bf16.mxu1 %v872_v0  ;;  %v693_v41 = vpack.c.bf16 %v267_v40, %v266_v39  ;;  %v269_v43 = vld [vmem:[#allocation7 + $0xb8] sm:$0xff]  ;;  %v270_v45 = vld [vmem:[#allocation7 + $0xc0] sm:$0xff]  ;;  %v271_v46 = vld [vmem:[#allocation7 + $0xc8] sm:$0xff] }
  0x54   :  { %549 = vmatmul.mubr.msk.f32.vlgmr.msra.gmra.mrb[0].mxu0 %vm92_vm1, %v80_v16  ;;  %v696_v44 = vpack.c.bf16 %v269_v43, %v268_v42  ;;  %v699_v47 = vpack.c.bf16 %v271_v46, %v270_v45  ;;  %v272_v48 = vld [vmem:[#allocation7 + $0xd0] sm:$0xff]  ;;  %v273_v49 = vld [vmem:[#allocation7 + $0xd8] sm:$0xff]  ;;  %v274_v51 = vld [vmem:[#allocation7 + $0xe0] sm:$0xff] }
  0x55   :  { %618 = vmatprep.mubr.msk.f32.mxu0 %vm873_vm0, %v874_v1  ;;  %688 = vmatpush3.bf16.msra.mxu0 %v687_v36  ;;  %v702_v50 = vpack.c.bf16 %v273_v49, %v272_v48  ;;  %v275_v52 = vld [vmem:[#allocation7 + $0xe8] sm:$0xff]  ;;  %v478_v54 = vld [vmem:[%s1033_s2] ss:$0 sm:$0xff]  ;;  %v276_v59 = vld [vmem:[#allocation7 + $0xf0] sm:$0xff] }
  0x56   :  { %670 = vmatpush3.bf16.msra.mxu1 %v669_v17  ;;  %689 = vmatprep.subr.bf16.mxu0 %v872_v0  ;;  %v705_v53 = vpack.c.bf16 %v275_v52, %v274_v51  ;;  %v277_v60 = vld [vmem:[#allocation7 + $0xf8] sm:$0xff]  ;;  %v357_v62 = vld [vmem:[#allocation8] sm:$0xff]  ;;  %v358_v63 = vld [vmem:[#allocation8 + $0x8] sm:$0xff] }
  0x57   :  { %671 = vmatprep.subr.bf16.mxu1 %v872_v0  ;;  %v708_v61 = vpack.c.bf16 %v277_v60, %v276_v59  ;;  %v359_v2 = vld [vmem:[#allocation8 + $0x10] sm:$0xff]  ;;  %v711_v3 = vpack.c.bf16 %v358_v63, %v357_v62  ;;  %v360_v4 = vld [vmem:[#allocation8 + $0x18] sm:$0xff]  ;;  %v361_v6 = vld [vmem:[#allocation8 + $0x20] sm:$0xff] }
  0x58   :  { %v714_v5 = vpack.c.bf16 %v360_v4, %v359_v2  ;;  %v362_v7 = vld [vmem:[#allocation8 + $0x28] sm:$0xff]  ;;  %v364_v9 = vld [vmem:[#allocation8 + $0x38] sm:$0xff]  ;;  %v365_v11 = vld [vmem:[#allocation8 + $0x40] sm:$0xff] }
  0x59   :  { %691 = vmatpush3.bf16.msra.mxu0 %v690_v38  ;;  %v717_v8 = vpack.c.bf16 %v362_v7, %v361_v6  ;;  %v366_v12 = vld [vmem:[#allocation8 + $0x48] sm:$0xff]  ;;  %v367_v14 = vld [vmem:[#allocation8 + $0x50] sm:$0xff]  ;;  %v368_v15 = vld [vmem:[#allocation8 + $0x58] sm:$0xff] }
  0x5a   :  { %673 = vmatpush3.bf16.msra.mxu1 %v672_v20  ;;  %692 = vmatprep.subr.bf16.mxu0 %v872_v0  ;;  %v723_v13 = vpack.c.bf16 %v366_v12, %v365_v11  ;;  %v726_v16 = vpack.c.bf16 %v368_v15, %v367_v14  ;;  %v369_v17 = vld [vmem:[#allocation8 + $0x60] sm:$0xff]  ;;  %v370_v18 = vld [vmem:[#allocation8 + $0x68] sm:$0xff]  ;;  %v480_v20 = vld [vmem:[%s1035_s4] ss:$0 sm:$0xff] }
  0x5b   :  { %674 = vmatprep.subr.bf16.mxu1 %v872_v0  ;;  %v729_v19 = vpack.c.bf16 %v370_v18, %v369_v17  ;;  %v371_v25 = vld [vmem:[#allocation8 + $0x70] sm:$0xff]  ;;  %v482_v28 = vld [vmem:[%s1035_s4 + $0x1] ss:$0 sm:$0xff]  ;;  %s875_s4 = smov [#allocation10]  }
  0x5c   :  { %s467_s30 = sshll.u32 %s875_s4, 4  ;;  %s468_s30 = int_to_ptr.vmem [resolvable:$true] %s467_s30 }
  0x5d   :  { %694 = vmatpush3.bf16.msra.mxu0 %v693_v41  ;;  %p841_p5 = scmp.lt.s32.totalorder %s468_s30, %s468_s30 }
  0x5e   :  { %676 = vmatpush3.bf16.msra.mxu1 %v675_v23  ;;  %695 = vmatprep.subr.bf16.mxu0 %v872_v0 }
  0x5f   :  { %677 = vmatprep.subr.bf16.mxu1 %v872_v0 }
  0x61   :  { %697 = vmatpush3.bf16.msra.mxu0 %v696_v44 }
  0x62   :  { %679 = vmatpush3.bf16.msra.mxu1 %v678_v26  ;;  %698 = vmatprep.subr.bf16.mxu0 %v872_v0  ;;  %v372_v26 = vld [vmem:[#allocation8 + $0x78] sm:$0xff] }
  0x63   :  { %680 = vmatprep.subr.bf16.mxu1 %v872_v0  ;;  %v732_v27 = vpack.c.bf16 %v372_v26, %v371_v25 }
  0x65   :  { %700 = vmatpush3.bf16.msra.mxu0 %v699_v47 }
  0x66   :  { %682 = vmatpush3.bf16.msra.mxu1 %v681_v29  ;;  %701 = vmatprep.subr.bf16.mxu0 %v872_v0 }
  0x67   :  { %683 = vmatprep.subr.bf16.mxu1 %v872_v0 }
  0x69   :  { %703 = vmatpush3.bf16.msra.mxu0 %v702_v50 }
  0x6a   :  { %685 = vmatpush3.bf16.msra.mxu1 %v684_v32  ;;  %704 = vmatprep.subr.bf16.mxu0 %v872_v0  ;;  %v483_v32 = vld [vmem:[%s1037_s6] ss:$0 sm:$0xff]  ;;  %s836_s6 = scalar_lea.vmem %s468_s30, 128 }
  0x6b   :  { %710 = vmatprep.subr.bf16.mxu1 %v872_v0  ;;  %p837_p4 = scmp.ne.s32.totalorder %s468_s30, %s836_s6  ;;  %p842_p6 = scmp.lt.s32.totalorder %s836_s6, %s836_s6 }
  0x6d   :  { %706 = vmatpush3.bf16.msra.mxu0 %v705_v53  ;;  %p843_p7 = por %p842_p6, %p841_p5 }
  0x6e   :  { %707 = vmatprep.subr.bf16.mxu0 %v872_v0 }
  0x6f   :  { %p844_p8 = pnand %p843_p7, %p837_p4 }
  0x71   :  { %709 = vmatpush3.bf16.msra.mxu0 %v708_v61 }
 0x127   :  { %v162_v55 = vpop.f32.mrb[0].mxu0 }
 0x128   :  { %v163_v56 = vadd.f32 %v478_v54, %v162_v55  ;;  %v550_v57 = vpop.f32.mrb[1].mxu0 }
 0x12a   :  { %v166_v58 = vmax.f32 %v163_v56, 0.0 }
 0x12c   :  { %584 = vmatmul.mubr.f32.vlgmr.msra.gmra.mrb[0].mxu1 %v166_v58 }
 0x12d   :  { %653 = vmatprep.mubr.msk.f32.mxu1 %vm873_vm0, %v874_v1  ;;  %712 = vmatpush3.bf16.msra.mxu1 %v711_v3  ;;  %v363_v1 = vld [vmem:[#allocation8 + $0x30] sm:$0xff] }
 0x12e   :  { %713 = vmatprep.subr.bf16.mxu1 %v872_v0  ;;  %v720_v10 = vpack.c.bf16 %v364_v9, %v363_v1 }
 0x131   :  { %715 = vmatpush3.bf16.msra.mxu1 %v714_v5 }
 0x132   :  { %716 = vmatprep.subr.bf16.mxu1 %v872_v0 }
 0x135   :  { %718 = vmatpush3.bf16.msra.mxu1 %v717_v8 }
 0x136   :  { %719 = vmatprep.subr.bf16.mxu1 %v872_v0 }
 0x139   :  { %721 = vmatpush3.bf16.msra.mxu1 %v720_v10 }
 0x13a   :  { %722 = vmatprep.subr.bf16.mxu1 %v872_v0 }
 0x13d   :  { %724 = vmatpush3.bf16.msra.mxu1 %v723_v13 }
 0x13e   :  { %725 = vmatprep.subr.bf16.mxu1 %v872_v0 }
 0x141   :  { %727 = vmatpush3.bf16.msra.mxu1 %v726_v16 }
 0x142   :  { %728 = vmatprep.subr.bf16.mxu1 %v872_v0 }
 0x145   :  { %730 = vmatpush3.bf16.msra.mxu1 %v729_v19 }
 0x146   :  { %731 = vmatprep.subr.bf16.mxu1 %v872_v0 }
 0x149   :  { %733 = vmatpush3.bf16.msra.mxu1 %v732_v27 }
 0x1ff   :  { %v256_v21 = vpop.f32.mrb[0].mxu1 }
 0x200   :  { %v257_v22 = vadd.f32 %v480_v20, %v256_v21  ;;  %v585_v23 = vpop.f32.mrb[1].mxu1 }
 0x202   :  { %v260_v24 = vmax.f32 %v257_v22, 0.0 }
 0x204   :  { %619 = vmatmul.mubr.f32.vlgmr.msra.gmra.mrb[2].mxu0 %v260_v24 }
 0x2d7   :  { %v352_v29 = vpop.f32.mrb[2].mxu0 }
 0x2d8   :  { %v353_v30 = vadd.f32 %v482_v28, %v352_v29  ;;  %v620_v0 = vpop.f32.mrb[3].mxu0 }
 0x2da   :  { %v356_v31 = vmax.f32 %v353_v30, 0.0 }
 0x2dc   :  { %654 = vmatmul.mubr.f32.vlgmr.msra.gmra.mrb[2].mxu1 %v356_v31 }
 0x3af   :  { %v446_v33 = vpop.f32.mrb[2].mxu1 }
 0x3b0   :  { %v447_v34 = vadd.f32 %v483_v32, %v446_v33  ;;  %v655_v35 = vpop.f32.mrb[3].mxu1 }
 0x3b2   :  { %450 = vmax.xlane.f32.xlu0 %v447_v34 }
 0x43f   :  { %v451_v36 = vpop.xlane.xlu0 %450 }
 0x440   :  { %v452_v37 = vsub.f32 %v447_v34, %v451_v36 }
 0x442   :  { %v453_v38 = vmul.f32 1.442695, %v452_v37 }
 0x444   :  { %744 = vpow2.f32 %v453_v38 }
 0x44e   :  { %v745_v39 = vpop.eup %744 }
 0x44f   :  { %455 = vadd.xlane.f32.xlu0 %v745_v39 }
 0x4dc   :  { %v456_v40 = vpop.xlane.xlu0 %455 }
 0x4dd   :  { %746 = vrcp.f32 %v456_v40 }
 0x4e7   :  { %v747_v41 = vpop.eup %746 }
 0x4e8   :  { %v458_v42 = vmul.f32 %v747_v41, %v745_v39 }
 0x4ea   :  { %460 = vst.msk [vmem:[#allocation10] sm:$0xff] %vm459_vm2, %v458_v42 }
 0x4eb   :  { %847 = shalt.err (!%p844_p8)
}
 0x4ec   :  { %s848_s10 = scalar_lea.hbm %s1038_s7, 128 }
 0x4ed   :  { %p849_p9 = scmp.ne.s32.totalorder %s1038_s7, %s848_s10  ;;  %p852_p10 = scmp.lt.u32.totalorder %s848_s10, %s1038_s7 }
 0x4ef   :  { %p854_p11 = pnand %p852_p10, %p849_p9 }
 0x4f1   :  { %857 = shalt.err (!%p854_p11)
}
 0x4f2   :  { %470 = dma.vmem_to_hbm [thread:$0]  %s468_s30, 128, %s1038_s7, [#allocation4]  }
 0x4f3   :  { %864 = dma.done.wait [#allocation4], 128  }
 0x4f4   :  { %865 = vsyncadd [#allocation4], 4294967168 }
 0x4f5   :  { %474 = vsyncpa [#allocation3], 1 }
 0x4f6   :  { %475 = vsyncpa [#allocation6], 1 }
 0x4f7   :  { %476 = vsyncpa [#allocation9], 1 }
 0x4f8   :  { %477 = vsyncpa [#allocation4], 1 }

</bundles_post_ra>
